<compile_context>
chip_gen: v7x
topology: tpu7x:2x2x1
jax: 0.10.0
libtpu: 0.0.40
codegen_flags: <defaults>
</compile_context>

<pallas_src>
import jax
import jax.numpy as jnp
from jax.experimental import pallas as pl
from jax.experimental.pallas import tpu as pltpu


# Below this size, XLA's own copy beats Pallas custom-call launch overhead.
_SMALL_PARAM_BYTES = 4 << 20
# Above this size, split the DMA into concurrent chunk copies.
_CHUNK_DMA_BYTES = 32 << 20
_MAX_DMA_CHUNKS = 8


def _single_dma_copy_kernel(v_hbm_ref, o_hbm_ref, copy_sem):
    # One whole-array HBM -> HBM DMA; no VMEM round trip, shape-agnostic.
    cp = pltpu.make_async_copy(v_hbm_ref, o_hbm_ref, copy_sem)
    cp.start()
    cp.wait()


def _make_chunked_dma_copy_kernel(chunks):
    """chunks: static tuple of (start_row, num_rows) along dim 0."""

    def kernel(v_hbm_ref, o_hbm_ref, copy_sems):
        copies = []
        for i, (start, size) in enumerate(chunks):
            cp = pltpu.make_async_copy(
                v_hbm_ref.at[pl.ds(start, size)],
                o_hbm_ref.at[pl.ds(start, size)],
                copy_sems.at[i],
            )
            cp.start()  # issue all descriptors first -> concurrent DMAs
            copies.append(cp)
        for cp in copies:
            cp.wait()

    return kernel


def _pallas_dma_copy(value: jax.Array, *, n_chunks: int | None = None) -> jax.Array:
    """Fresh-buffer copy of `value` via direct HBM->HBM DMA (zero VMEM footprint)."""
    nbytes = value.size * value.dtype.itemsize
    rows = value.shape[0] if value.ndim >= 1 else 1

    if n_chunks is None:
        n_chunks = _MAX_DMA_CHUNKS if nbytes >= _CHUNK_DMA_BYTES else 1
    n_chunks = max(1, min(int(n_chunks), rows))

    if n_chunks == 1 or value.ndim == 0:
        kernel = _single_dma_copy_kernel
        scratch_shapes = [pltpu.SemaphoreType.DMA(())]
    else:
        base, rem = divmod(rows, n_chunks)
        chunks, start = [], 0
        for i in range(n_chunks):
            size = base + (1 if i < rem else 0)
            chunks.append((start, size))
            start += size
        kernel = _make_chunked_dma_copy_kernel(tuple(chunks))
        scratch_shapes = [pltpu.SemaphoreType.DMA((n_chunks,))]

    return pl.pallas_call(
        kernel,
        out_shape=jax.ShapeDtypeStruct(value.shape, value.dtype),
        in_specs=[pl.BlockSpec(memory_space=pl.ANY)],   # raw HBM ref, no auto-DMA
        out_specs=pl.BlockSpec(memory_space=pl.ANY),    # raw HBM ref, no auto-DMA
        scratch_shapes=scratch_shapes,
        cost_estimate=pl.CostEstimate(
            flops=0, transcendentals=0, bytes_accessed=2 * nbytes
        ),
    )(value)


def wrapped_parameter_forward(
    value: jax.Array, *, copy: bool = False, force_pallas: bool = False,
    n_chunks: int | None = None,
) -> jax.Array:
    """Pallas equivalent of WrappedParameter.forward().

    Default (copy=False): true identity — the parameter array is returned with
    zero bytes moved (exact PyTorch semantics: forward() returns the Parameter).

    copy=True: materialize a fresh buffer.  Small parameters use an XLA copy;
    larger ones use the HBM->HBM DMA Pallas kernel (chunked when very large).
    force_pallas=True forces the Pallas path regardless of size (used in tests).
    """
    if not copy:
        return value

    nbytes = value.size * jnp.dtype(value.dtype).itemsize
    if nbytes < _SMALL_PARAM_BYTES and not force_pallas:
        # Let XLA emit / fuse / elide the tiny copy.
        return jnp.copy(value)

    return _pallas_dma_copy(value, n_chunks=n_chunks)


class WrappedParameterPallas:
    """Mirror of the PyTorch module: holds a parameter, forward() returns it."""

    def __init__(self, value: jax.Array, *, copy: bool = False):
        self.value = value        # nn.Parameter equivalent (just an array in JAX)
        self.copy = copy          # default False == identity (PyTorch semantics)

    def __call__(self, *, force_pallas: bool = False,
                 n_chunks: int | None = None) -> jax.Array:
        return wrapped_parameter_forward(
            self.value, copy=self.copy, force_pallas=force_pallas, n_chunks=n_chunks
        )


if __name__ == "__main__":
    key = jax.random.PRNGKey(0)
    k0, k1, k2, k3 = jax.random.split(key, 4)

    # Parameter shaped like a small dense-head weight blob.
    v_param = jax.random.normal(k0, (2, 4, 16, 16), dtype=jnp.float32)
    # Non-tile-aligned 2-D parameter (rows not divisible by 8, lanes < 128).
    v_odd = jax.random.normal(k1, (10, 9), dtype=jnp.float32)
    # 1-D parameter with an odd length.
    v_1d = jax.random.normal(k2, (257,), dtype=jnp.float32)
    # Tile-aligned parameter to exercise the chunked concurrent-DMA path.
    v_aligned = jax.random.normal(k3, (128, 128), dtype=jnp.float32)

    # 1) Default path: true identity, zero bytes moved (PyTorch semantics).
    mod = WrappedParameterPallas(v_param)
    out_identity = jax.block_until_ready(mod())
    assert out_identity is v_param
    assert bool(jnp.array_equal(out_identity, v_param))

    # 2) Copy path, small param, no force -> XLA copy (Pallas bypassed).
    out_xla = jax.block_until_ready(WrappedParameterPallas(v_param, copy=True)())
    assert out_xla.shape == v_param.shape and out_xla.dtype == v_param.dtype
    assert bool(jnp.array_equal(out_xla, v_param))

    # 3) Pallas single-DMA kernel on awkward shapes (forced, to exercise kernel).
    for v in (v_param, v_odd, v_1d):
        out = jax.block_until_ready(
            WrappedParameterPallas(v, copy=True)(force_pallas=True)
        )
        assert out.shape == v.shape and out.dtype == v.dtype
        assert bool(jnp.array_equal(out, v))

    # 4) Pallas chunked concurrent-DMA kernel (forced chunk count).
    out_chunked = jax.block_until_ready(
        WrappedParameterPallas(v_aligned, copy=True)(force_pallas=True, n_chunks=4)
    )
    assert out_chunked.shape == v_aligned.shape
    assert bool(jnp.array_equal(out_chunked, v_aligned))

    print("KERNEL_OK")
</pallas_src>

<mosaic_0001>
module attributes {stable_mosaic.version = 11 : i64} {
  func.func @_single_dma_copy_kernel(%arg0: memref<2x4x16x16xf32, #tpu.memory_space<any>>, %arg1: memref<2x4x16x16xf32, #tpu.memory_space<any>>, %arg2: memref<!tpu.dma_semaphore, #tpu.memory_space<semaphore_mem>>) attributes {dimension_semantics = [], scalar_prefetch = 0 : i64, scratch_operands = 1 : i64, tpu.core_type = #tpu.core_type<tc>} {
    tpu.enqueue_dma source(%arg0 : memref<2x4x16x16xf32, #tpu.memory_space<any>>) target(%arg1 : memref<2x4x16x16xf32, #tpu.memory_space<any>>) target_semaphore(%arg2 : memref<!tpu.dma_semaphore, #tpu.memory_space<semaphore_mem>>)
    tpu.wait_dma2 semaphore(%arg2 : memref<!tpu.dma_semaphore, #tpu.memory_space<semaphore_mem>>) src(%arg0 : memref<2x4x16x16xf32, #tpu.memory_space<any>>) dst(%arg1 : memref<2x4x16x16xf32, #tpu.memory_space<any>>)
    return
  }
}

</mosaic_0001>

<bundles_post_ra>
// kernel: tpu_custom_call.1
= control target key start
LH: loop header
LB: loop body
LE: loop exit
PB: predicated region body
PF: predicated region fallthrough
CT: control target
= control target key end

     0   :  { %s36_s6 = smov [#allocation2]   ;;  %s37_s7 = smov [#allocation3]   ;;  %s55_s0 = inlined_call_operand.hbm [shape: f32[2,4,16,16], index: 0, kind: input, shape index: {}]   ;;  %s56_s1 = inlined_call_operand.hbm [shape: f32[2,4,16,16], index: 1, kind: output, shape index: {}]  }
   0x1   :  { %s38_s8 = smov 0  }
   0x2   :  { %18 = dma.general %s55_s0, 2048, %s56_s1, %s36_s6, %s37_s7, [#allocation4], %s38_s8, 0  }
   0x3   :  { %34 = dma.done.wait [#allocation2], 2048 }
   0x4   :  { %35 = vsyncadd [#allocation2], 4294965248 }
   0x5   :  { %24 = vsyncmov [#allocation2] }
   0x8   :  { %s25_s13 = vpop.sfrf %24 }
   0x9   :  { %p30_p0 = scmp.ne.s32.totalorder %s25_s13, 0 }
   0xb   :  { %29 = shalt.err (%p30_p0)  }

</bundles_post_ra>
